<compile_context>
chip_gen: v7x
topology: tpu7x:2x2x1
jax: 0.10.0
libtpu: 0.0.40
codegen_flags: <defaults>
</compile_context>

<pallas_src>
import jax
import jax.numpy as jnp
from jax.experimental import pallas as pl
from jax.experimental.pallas import tpu as pltpu


def _hbm_copy_kernel(x_hbm_ref, o_hbm_ref, sem):
    # Single whole-array HBM -> HBM DMA.  No VMEM staging, no grid loop.
    cp = pltpu.make_async_copy(x_hbm_ref, o_hbm_ref, sem)
    cp.start()
    cp.wait()


def _identity_copy(x):
    """Explicit op-boundary identity: one contiguous HBM->HBM DMA."""
    if x.size == 0:
        # Nothing to move; identity semantics hold without a kernel.
        return x

    itemsize = jnp.dtype(x.dtype).itemsize
    return pl.pallas_call(
        _hbm_copy_kernel,
        out_shape=jax.ShapeDtypeStruct(x.shape, x.dtype),
        in_specs=[pl.BlockSpec(memory_space=pl.ANY)],
        out_specs=pl.BlockSpec(memory_space=pl.ANY),
        scratch_shapes=[pltpu.SemaphoreType.DMA(())],
        cost_estimate=pl.CostEstimate(
            flops=0,
            transcendentals=0,
            bytes_accessed=2 * x.size * itemsize,  # read + write
        ),
    )(x)


class DummyInputLayerNorm:
    """JAX/Pallas port of the identity layernorm stub."""

    def __init__(self, weight=None, bias=None):
        # Parameters are held (as in the nn.Module) but never applied.
        self.weight = weight
        self.bias = bias

    def __call__(self, x, *, force_kernel: bool = False):
        # forward(x) == x: the optimal implementation launches no kernel at all.
        if not force_kernel:
            return x
        # Explicit op boundary requested: run the whole-array HBM->HBM DMA copy.
        # (If a distinct output buffer is ever not required, this could instead
        #  become an aliased no-op via input_output_aliases={0: 0}; kept as a
        #  real copy here to preserve "new buffer" op-boundary semantics.)
        return _identity_copy(x)


if __name__ == "__main__":
    key = jax.random.PRNGKey(0)
    k_x, k_w, k_b = jax.random.split(key, 3)

    seq, hidden = 8, 32
    x = jax.random.normal(k_x, (seq, hidden), dtype=jnp.float32)

    # Deterministic (unused) parameters, mirroring the optional weight/bias
    # of the original module's __init__.
    weight = jax.random.normal(k_w, (hidden,), dtype=jnp.float32)
    bias = jax.random.normal(k_b, (hidden,), dtype=jnp.float32)

    layer = DummyInputLayerNorm(weight=weight, bias=bias)

    # Default (optimized) path: no kernel, no copy.
    out_fast = layer(x)
    assert out_fast is x

    # Kernel path: single HBM->HBM DMA identity copy on TPU.
    out_kernel = layer(x, force_kernel=True)
    out_kernel = jax.block_until_ready(out_kernel)

    assert out_kernel.shape == x.shape and out_kernel.dtype == x.dtype
    assert bool(jnp.array_equal(out_kernel, x))

    # Also exercise a non-128-multiple / odd-shaped input (previously skipped).
    x_odd = jax.random.normal(k_x, (3, 5, 7), dtype=jnp.bfloat16)
    out_odd = jax.block_until_ready(layer(x_odd, force_kernel=True))
    assert bool(jnp.array_equal(out_odd, x_odd))

    print("KERNEL_OK")
</pallas_src>

<mosaic_0001>
module attributes {stable_mosaic.version = 11 : i64} {
  func.func @_hbm_copy_kernel(%arg0: memref<8x32xf32, #tpu.memory_space<any>>, %arg1: memref<8x32xf32, #tpu.memory_space<any>>, %arg2: memref<!tpu.dma_semaphore, #tpu.memory_space<semaphore_mem>>) attributes {dimension_semantics = [], scalar_prefetch = 0 : i64, scratch_operands = 1 : i64, tpu.core_type = #tpu.core_type<tc>} {
    tpu.enqueue_dma source(%arg0 : memref<8x32xf32, #tpu.memory_space<any>>) target(%arg1 : memref<8x32xf32, #tpu.memory_space<any>>) target_semaphore(%arg2 : memref<!tpu.dma_semaphore, #tpu.memory_space<semaphore_mem>>)
    tpu.wait_dma2 semaphore(%arg2 : memref<!tpu.dma_semaphore, #tpu.memory_space<semaphore_mem>>) src(%arg0 : memref<8x32xf32, #tpu.memory_space<any>>) dst(%arg1 : memref<8x32xf32, #tpu.memory_space<any>>)
    return
  }
}

</mosaic_0001>

<bundles_post_ra>
// kernel: tpu_custom_call.1
= control target key start
LH: loop header
LB: loop body
LE: loop exit
PB: predicated region body
PF: predicated region fallthrough
CT: control target
= control target key end

     0   :  { %s34_s6 = smov [#allocation2]   ;;  %s35_s7 = smov [#allocation3]   ;;  %s53_s0 = inlined_call_operand.hbm [shape: f32[8,32], index: 0, kind: input, shape index: {}]   ;;  %s54_s1 = inlined_call_operand.hbm [shape: f32[8,32], index: 1, kind: output, shape index: {}]  }
   0x1   :  { %s36_s8 = smov 0  }
   0x2   :  { %18 = dma.general %s53_s0, 128, %s54_s1, %s34_s6, %s35_s7, [#allocation4], %s36_s8, 0  }
   0x3   :  { %32 = dma.done.wait [#allocation2], 128 }
   0x4   :  { %33 = vsyncadd [#allocation2], 4294967168 }
   0x5   :  { %22 = vsyncmov [#allocation2] }
   0x8   :  { %s23_s13 = vpop.sfrf %22 }
   0x9   :  { %p28_p0 = scmp.ne.s32.totalorder %s23_s13, 0 }
   0xb   :  { %27 = shalt.err (%p28_p0)  }

</bundles_post_ra>
